<compile_context>
chip_gen: v5e
topology: v5e:2x2
jax: 0.10.0
libtpu: 0.0.40
codegen_flags: <defaults>
</compile_context>

<pallas_src>
import jax
import jax.numpy as jnp
from jax.experimental import pallas as pl
from jax.experimental.pallas import tpu as pltpu

LANE = 128          # channel dims padded to multiples of this (lane / MXU N)
SUBLANE = 8         # W dims padded to multiples of this (sublane)
SMALL_CIN_MAX = 16  # <= this: 3x3 uses the wrapper-side im2col path


def _round_up(x, m):
    return (x + m - 1) // m * m


def _cdiv(a, b):
    return -(-a // b)


# ---------------------------------------------------------------------------
# kernels (NHWC, channels on the lane dimension)
# ---------------------------------------------------------------------------
def _silu(acc):
    # SiLU(x) = x * sigmoid(x); the reciprocal goes to the EUP slot.
    return acc * pl.reciprocal(1.0 + jnp.exp(-acc), approx=True)


def _cbl_matmul_kernel(x_ref, w_ref, s_ref, b_ref, o_ref):
    """1x1 conv (or pre-im2col'ed small-Cin 3x3) + folded BN + SiLU."""
    # x_ref: (1, TH, W, K) bf16 | w_ref: (K, CoT) bf16 | s/b: (1, CoT) f32
    th, wd, kd = x_ref.shape[1], x_ref.shape[2], x_ref.shape[3]
    cot = o_ref.shape[3]
    x2 = x_ref[0].reshape(th * wd, kd)                       # contiguous view
    acc = jnp.dot(x2, w_ref[...], preferred_element_type=jnp.float32)
    acc = acc * s_ref[...] + b_ref[...]                      # folded BN (f32)
    o_ref[0] = _silu(acc).reshape(th, wd, cot).astype(o_ref.dtype)


def _cbl_3x3_kernel(cur_ref, top_ref, bot_ref, w_ref, s_ref, b_ref, o_ref,
                    xs_ref):
    """3x3 conv (Cin padded to >=128) + folded BN + SiLU on one row tile."""
    # cur_ref: (1, TH, Wp, Ci) bf16   row tile, W pre-padded with conv halo
    # top_ref: (1, 1,  Wp, Ci) bf16   row above the tile (zero row at edges)
    # bot_ref: (1, 1,  Wp, Ci) bf16   row below the tile (zero row at edges)
    # w_ref  : (9, Ci, CoT) bf16      weight tap (ky, kx) at index 3*ky + kx
    # s/b    : (1, CoT) f32           folded BatchNorm scale / bias
    # xs_ref : (TH+2, Wp, Ci) bf16    VMEM scratch: tile + H halo rows
    th, ci = cur_ref.shape[1], cur_ref.shape[3]
    wout, cot = o_ref.shape[2], o_ref.shape[3]

    # Assemble the H-haloed tile with full-width, sublane-aligned stores.
    xs_ref[0:1] = top_ref[0]
    xs_ref[1:th + 1] = cur_ref[0]
    xs_ref[th + 1:th + 2] = bot_ref[0]

    # 9 MXU matmuls with K = Ci (no im2col concat -> no big VMEM slab copies).
    acc = jnp.zeros((th * wout, cot), jnp.float32)
    for ky in range(3):                                      # static unroll
        for kx in range(3):
            slab = xs_ref[ky:ky + th, kx:kx + wout, :].reshape(th * wout, ci)
            acc = acc + jnp.dot(slab, w_ref[3 * ky + kx],
                                preferred_element_type=jnp.float32)

    acc = acc * s_ref[...] + b_ref[...]                      # folded BN (f32)
    o_ref[0] = _silu(acc).reshape(th, wout, cot).astype(o_ref.dtype)


# ---------------------------------------------------------------------------
# parameter preparation (wrapper-side layout work)
# ---------------------------------------------------------------------------
def _fold_bn(gamma, beta, mean, var, eps):
    s = gamma / jnp.sqrt(var + eps)
    return s, beta - mean * s


def init_cbl_params(key, in_channels, out_channels, kernel_size=1, eps=1e-5):
    """Deterministic synthetic parameters mirroring CBL.__init__ shapes."""
    k = jax.random.split(key, 5)
    w = 0.1 * jax.random.normal(
        k[0], (out_channels, in_channels, kernel_size, kernel_size),
        jnp.float32)
    gamma = 1.0 + 0.1 * jax.random.normal(k[1], (out_channels,), jnp.float32)
    beta = 0.1 * jax.random.normal(k[2], (out_channels,), jnp.float32)
    mean = 0.1 * jax.random.normal(k[3], (out_channels,), jnp.float32)
    var = jnp.abs(jax.random.normal(k[4], (out_channels,), jnp.float32)) + 0.5
    return dict(weight=w, gamma=gamma, beta=beta, running_mean=mean,
                running_var=var, eps=eps, kernel_size=kernel_size)


def prepare_kernel_params(p):
    """Fold BN (eval mode), pad channels, lay out weights per flavor."""
    w = p["weight"]
    cout, cin, kh, kw = w.shape
    k = p["kernel_size"]
    assert kh == kw == k
    coutp = _round_up(cout, LANE)

    s, b = _fold_bn(p["gamma"], p["beta"], p["running_mean"],
                    p["running_var"], p["eps"])
    s = jnp.pad(s, (0, coutp - cout)).reshape(1, coutp).astype(jnp.float32)
    b = jnp.pad(b, (0, coutp - cout)).reshape(1, coutp).astype(jnp.float32)

    if k == 1:
        flavor = "1x1"
        cin_eff = _round_up(cin, LANE)
        wk = jnp.pad(w[:, :, 0, 0], ((0, coutp - cout), (0, cin_eff - cin)))
        wk = jnp.transpose(wk, (1, 0)).astype(jnp.bfloat16)       # (K, Coutp)
    elif k == 3 and cin <= SMALL_CIN_MAX:
        flavor = "3x3_im2col"
        cin_eff = _round_up(9 * cin, SUBLANE)                     # K = 9*Cin
        wk = jnp.transpose(w, (2, 3, 1, 0)).reshape(9 * cin, cout)
        wk = jnp.pad(wk, ((0, cin_eff - 9 * cin), (0, coutp - cout)))
        wk = wk.astype(jnp.bfloat16)                              # (K, Coutp)
    elif k == 3:
        flavor = "3x3"
        cin_eff = _round_up(cin, LANE)
        wk = jnp.pad(w, ((0, coutp - cout), (0, cin_eff - cin), (0, 0),
                         (0, 0)))
        wk = jnp.transpose(wk, (2, 3, 1, 0)).reshape(9, cin_eff, coutp)
        wk = wk.astype(jnp.bfloat16)                        # (9, Cinp, Coutp)
    else:
        raise NotImplementedError("kernel_size must be 1 or 3")
    return dict(w=wk, s=s, b=b, k=k, flavor=flavor, cin=cin, cout=cout,
                coutp=coutp, cin_eff=cin_eff)


# ---------------------------------------------------------------------------
# VMEM-aware tile sizing
# ---------------------------------------------------------------------------
def _vmem_budget_bytes():
    try:
        cap = int(pltpu.get_tpu_info().vmem_capacity_bytes)
    except Exception:
        cap = 64 * 1024 * 1024                  # conservative (v7x per-core)
    return min(100 * 1024 * 1024, (3 * cap) // 4)


def _step_vmem_bytes(th, wp_in, wout, cin_eff, co_tile, flavor):
    bf, f4 = 2, 4
    kdim_total = 9 * cin_eff if flavor == "3x3" else cin_eff
    total = 2 * th * wp_in * cin_eff * bf        # input tile, double-buffered
    total += 2 * th * wout * co_tile * bf        # bf16 output, double-buffered
    total += 2 * (kdim_total * co_tile * bf + 2 * co_tile * f4)   # weights+BN
    total += 2 * th * wout * co_tile * f4        # f32 acc + epilogue temps
    if flavor == "3x3":
        total += 2 * 2 * wp_in * cin_eff * bf    # two 1-row halos, dbl-buffered
        total += (th + 2) * wp_in * cin_eff * bf  # xs scratch
        total += 2 * th * wout * cin_eff * bf    # strided-slice staging slabs
    return total


def _choose_row_tiling(h, n, nco, wp_in, wout, cin_eff, co_tile, flavor,
                       budget, max_tile_h=None):
    fit = int(budget * 0.8)                      # headroom for the compiler
    cap = 256 if max_tile_h is None else max(1, int(max_tile_h))
    th = min(h, cap)
    while th > 1 and _step_vmem_bytes(th, wp_in, wout, cin_eff, co_tile,
                                      flavor) > fit:
        th -= 1
    nh = _cdiv(h, th)
    # v7x megacore: keep a few parallel grid steps so both TensorCores work.
    min_steps = 4
    if n * nh * nco < min_steps:
        nh = min(h, max(nh, _cdiv(min_steps, max(1, n * nco))))
    th = _cdiv(h, nh)
    nh = _cdiv(h, th)
    return th, nh


# ---------------------------------------------------------------------------
# forward wrapper
# ---------------------------------------------------------------------------
def cbl_forward(x_nchw, kp, *, co_tile=None, max_tile_h=None,
                out_dtype=jnp.float32):
    """CBL forward (eval-mode BN).  x_nchw: (N, C, H, W) float32 (NCHW)."""
    n, c, h, w = x_nchw.shape
    if c != kp["cin"]:
        raise ValueError("channel mismatch between input and parameters")
    flavor = kp["flavor"]
    cout, coutp, cin_eff = kp["cout"], kp["coutp"], kp["cin_eff"]

    # ---- Cout tiling (third grid axis) -------------------------------------
    if co_tile is None:
        co_tile = 256 if coutp % 256 == 0 else LANE
    co_tile = min(co_tile, coutp)
    if coutp % co_tile != 0:
        co_tile = LANE                           # coutp is a multiple of 128
    nco = coutp // co_tile

    # ---- spatial tiling -----------------------------------------------------
    wout = _round_up(w, SUBLANE)
    wp_in = wout + SUBLANE if flavor == "3x3" else wout  # 3x3: W halo, aligned
    budget = _vmem_budget_bytes()
    th, nh = _choose_row_tiling(h, n, nco, wp_in, wout, cin_eff, co_tile,
                                flavor, budget, max_tile_h)
    hp = nh * th

    # ---- input layout: NCHW -> NHWC bf16, channel/spatial padding ----------
    x = jnp.transpose(x_nchw, (0, 2, 3, 1)).astype(jnp.bfloat16)
    if flavor == "3x3_im2col":
        # Small-Cin stem conv: pack the full 3x3 im2col (K = 9*Cin, rounded up
        # to 8 lanes) on the wrapper side; the conv becomes a single matmul
        # and Cin is never padded to 128.
        xp = jnp.pad(x, ((0, 0), (1, 1), (1, 1), (0, 0)))
        x = jnp.concatenate(
            [xp[:, ky:ky + h, kx:kx + w, :]
             for ky in range(3) for kx in range(3)], axis=-1)
        c_now = 9 * c
    else:
        c_now = c

    if flavor == "3x3":
        # One zero column of conv halo on the left, the rest on the right (so
        # the padded width stays a multiple of 8 and all in-kernel stores are
        # sublane-aligned).  One extra zero row at the bottom doubles as the
        # out-of-image halo row for the top of tile 0 / bottom of last tile.
        x = jnp.pad(x, ((0, 0), (0, hp - h + 1), (1, wp_in - w - 1),
                        (0, cin_eff - c_now)))
    else:
        x = jnp.pad(x, ((0, 0), (0, hp - h), (0, wp_in - w),
                        (0, cin_eff - c_now)))

    # ---- advisory cost estimate ---------------------------------------------
    kdim_total = 9 * cin_eff if flavor == "3x3" else cin_eff
    flops = 2 * n * hp * wout * kdim_total * coutp
    bytes_accessed = int(x.size * 2 + n * hp * wout * coutp * 2
                         + kp["w"].size * 2 + 2 * coutp * 4)
    cost = pl.CostEstimate(flops=int(flops),
                           transcendentals=int(n * hp * wout * coutp),
                           bytes_accessed=bytes_accessed)

    out_shape = jax.ShapeDtypeStruct((n, hp, wout, coutp), jnp.bfloat16)
    o_spec = pl.BlockSpec((1, th, wout, co_tile),
                          lambda i, j, co: (i, j, 0, co))
    cparams = pltpu.CompilerParams(
        dimension_semantics=("parallel", "parallel", "parallel"),
        vmem_limit_bytes=int(budget))

    def _const_spec(shape, index_map, single_buffer):
        # Constant-index operands: single-buffer them to reclaim VMEM when
        # there is only one Cout tile (their block index never changes).
        if single_buffer:
            return pl.BlockSpec(shape, index_map,
                                pipeline_mode=pl.Buffered(1))
        return pl.BlockSpec(shape, index_map)

    def _run(single_buffer_consts):
        s_spec = _const_spec((1, co_tile), lambda i, j, co: (0, co),
                             single_buffer_consts)
        if flavor == "3x3":
            w_spec = _const_spec((9, cin_eff, co_tile),
                                 lambda i, j, co: (0, 0, co),
                                 single_buffer_consts)
            cur_spec = pl.BlockSpec((1, th, wp_in, cin_eff),
                                    lambda i, j, co: (i, j, 0, 0))
            # 1-row halo blocks; image edges read the dedicated zero row hp.
            top_spec = pl.BlockSpec(
                (1, 1, wp_in, cin_eff),
                lambda i, j, co: (i, jnp.where(j == 0, hp, j * th - 1), 0, 0))
            bot_spec = pl.BlockSpec((1, 1, wp_in, cin_eff),
                                    lambda i, j, co: (i, j * th + th, 0, 0))
            return pl.pallas_call(
                _cbl_3x3_kernel,
                out_shape=out_shape,
                grid=(n, nh, nco),
                in_specs=[cur_spec, top_spec, bot_spec, w_spec, s_spec,
                          s_spec],
                out_specs=o_spec,
                scratch_shapes=[pltpu.VMEM((th + 2, wp_in, cin_eff),
                                           jnp.bfloat16)],
                compiler_params=cparams,
                cost_estimate=cost,
            )(x, x, x, kp["w"], kp["s"], kp["b"])
        else:
            w_spec = _const_spec((cin_eff, co_tile),
                                 lambda i, j, co: (0, co),
                                 single_buffer_consts)
            x_spec = pl.BlockSpec((1, th, wp_in, cin_eff),
                                  lambda i, j, co: (i, j, 0, 0))
            return pl.pallas_call(
                _cbl_matmul_kernel,
                out_shape=out_shape,
                grid=(n, nh, nco),
                in_specs=[x_spec, w_spec, s_spec, s_spec],
                out_specs=o_spec,
                compiler_params=cparams,
                cost_estimate=cost,
            )(x, kp["w"], kp["s"], kp["b"])

    single = nco == 1
    try:
        out = _run(single)
    except Exception:
        if not single:
            raise
        out = _run(False)          # fallback if pipeline_mode is unsupported

    out = out[:, :h, :w, :cout]
    # NCHW / f32 to mirror the PyTorch module; a full NHWC bf16 network would
    # keep `out` as-is and skip this boundary conversion.
    return jnp.transpose(out, (0, 3, 1, 2)).astype(out_dtype)


# ---------------------------------------------------------------------------
# pure-JAX reference (== PyTorch eval-mode CBL.forward)
# ---------------------------------------------------------------------------
def ref_cbl_forward(x, p):
    k = p["kernel_size"]
    pad = k // 2
    s, b = _fold_bn(p["gamma"], p["beta"], p["running_mean"],
                    p["running_var"], p["eps"])
    y = jax.lax.conv_general_dilated(
        x, p["weight"], window_strides=(1, 1),
        padding=((pad, pad), (pad, pad)),
        dimension_numbers=("NCHW", "OIHW", "NCHW"))
    y = y * s[None, :, None, None] + b[None, :, None, None]
    return y * jax.nn.sigmoid(y)


if __name__ == "__main__":
    key = jax.random.PRNGKey(0)
    kx1, kx2, kw1, kw2, kw3 = jax.random.split(key, 5)

    N, H, W = 2, 16, 16
    x_small = jax.random.normal(kx1, (N, 4, H, W), jnp.float32)
    x_wide = jax.random.normal(kx2, (N, 64, H, W), jnp.float32)

    # (input, key, kernel_size, cout, co_tile, max_tile_h) -> path exercised
    cases = [
        (x_small, kw1, 1, 8, None, None),    # 1x1 matmul path
        (x_small, kw2, 3, 8, None, None),    # 3x3 small-Cin (im2col) path
        (x_wide, kw3, 3, 160, 128, 8),       # 3x3 main path, 2 Cout + 2 H tiles
    ]
    for xin, kk, ksize, cco, cot, mth in cases:
        params = init_cbl_params(kk, xin.shape[1], cco, kernel_size=ksize)
        kparams = prepare_kernel_params(params)
        out = jax.block_until_ready(
            cbl_forward(xin, kparams, co_tile=cot, max_tile_h=mth))
        ref = ref_cbl_forward(xin, params)
        assert out.shape == ref.shape == (N, cco, H, W)
        # bf16 matmul operands + bf16 kernel output (f32 accumulation / BN /
        # SiLU) -> a few 1e-2 deviation from the pure-f32 reference.
        err = float(jnp.max(jnp.abs(out - ref)))
        assert bool(jnp.allclose(out, ref, rtol=5e-2, atol=5e-2)), (
            f"k={ksize} cin={xin.shape[1]} cout={cco}: max abs err = {err}")

    print("KERNEL_OK")
</pallas_src>

<mosaic_0001>
module attributes {stable_mosaic.version = 11 : i64} {
  func.func @_cbl_matmul_kernel(%arg0: i32, %arg1: i32, %arg2: i32, %arg3: memref<1x8x16x128xbf16, #tpu.memory_space<vmem>>, %arg4: memref<128x128xbf16, #tpu.memory_space<vmem>>, %arg5: memref<1x128xf32, #tpu.memory_space<vmem>>, %arg6: memref<1x128xf32, #tpu.memory_space<vmem>>, %arg7: memref<1x8x16x128xbf16, #tpu.memory_space<vmem>>) attributes {dimension_semantics = [#tpu.dimension_semantics<parallel>, #tpu.dimension_semantics<parallel>, #tpu.dimension_semantics<parallel>], iteration_bounds = array<i64: 2, 2, 1>, scalar_prefetch = 0 : i64, scratch_operands = 0 : i64, tpu.core_type = #tpu.core_type<tc>, window_params = [{transform_indices = @transform_0, window_bounds = array<i64: 1, 8, 16, 128>}, {pipeline_mode = #tpu.pipeline_mode<synchronous>, transform_indices = @transform_1, window_bounds = array<i64: 128, 128>}, {pipeline_mode = #tpu.pipeline_mode<synchronous>, transform_indices = @transform_2, window_bounds = array<i64: 1, 128>}, {pipeline_mode = #tpu.pipeline_mode<synchronous>, transform_indices = @transform_3, window_bounds = array<i64: 1, 128>}, {transform_indices = @transform_4, window_bounds = array<i64: 1, 8, 16, 128>}]} {
    %c0 = arith.constant 0 : index
    %c0_0 = arith.constant 0 : index
    %c0_1 = arith.constant 0 : index
    %c0_2 = arith.constant 0 : index
    %0 = vector.load %arg3[%c0, %c0_0, %c0_1, %c0_2] : memref<1x8x16x128xbf16, #tpu.memory_space<vmem>>, vector<1x8x16x128xbf16>
    %1 = vector.shape_cast %0 : vector<1x8x16x128xbf16> to vector<8x16x128xbf16>
    %2 = vector.shape_cast %1 : vector<8x16x128xbf16> to vector<128x128xbf16>
    %c0_3 = arith.constant 0 : index
    %c0_4 = arith.constant 0 : index
    %3 = vector.load %arg4[%c0_3, %c0_4] : memref<128x128xbf16, #tpu.memory_space<vmem>>, vector<128x128xbf16>
    %cst = arith.constant dense<0.000000e+00> : vector<128x128xf32>
    %4 = tpu.matmul %2, %3, %cst {dimension_numbers = #tpu.dot_dimension_numbers<[1], [0], [0], [1], [0, 0, 1, 1], [], []>} : vector<128x128xbf16>, vector<128x128xbf16>, vector<128x128xf32> -> vector<128x128xf32>
    %c0_5 = arith.constant 0 : index
    %c0_6 = arith.constant 0 : index
    %5 = vector.load %arg5[%c0_5, %c0_6] : memref<1x128xf32, #tpu.memory_space<vmem>>, vector<1x128xf32>
    %6 = vector.broadcast %5 : vector<1x128xf32> to vector<128x128xf32>
    %7 = arith.mulf %4, %6 : vector<128x128xf32>
    %c0_7 = arith.constant 0 : index
    %c0_8 = arith.constant 0 : index
    %8 = vector.load %arg6[%c0_7, %c0_8] : memref<1x128xf32, #tpu.memory_space<vmem>>, vector<1x128xf32>
    %9 = vector.broadcast %8 : vector<1x128xf32> to vector<128x128xf32>
    %10 = arith.addf %7, %9 : vector<128x128xf32>
    %cst_9 = arith.constant 0.000000e+00 : f32
    %11 = vector.broadcast %cst_9 : f32 to vector<128x128xf32>
    %12 = arith.subf %11, %10 : vector<128x128xf32>
    %13 = math.exp %12 : vector<128x128xf32>
    %cst_10 = arith.constant 1.000000e+00 : f32
    %14 = vector.broadcast %cst_10 : f32 to vector<128x128xf32>
    %15 = arith.addf %14, %13 : vector<128x128xf32>
    %16 = tpu.reciprocal %15 {approx = true} : vector<128x128xf32> -> vector<128x128xf32>
    %17 = arith.mulf %10, %16 : vector<128x128xf32>
    %18 = vector.shape_cast %17 : vector<128x128xf32> to vector<8x16x128xf32>
    %19 = arith.truncf %18 : vector<8x16x128xf32> to vector<8x16x128xbf16>
    %c0_11 = arith.constant 0 : index
    %c0_12 = arith.constant 0 : index
    %c0_13 = arith.constant 0 : index
    %c0_14 = arith.constant 0 : index
    %20 = vector.load %arg7[%c0_11, %c0_12, %c0_13, %c0_14] : memref<1x8x16x128xbf16, #tpu.memory_space<vmem>>, vector<1x8x16x128xbf16>
    %21 = vector.shape_cast %20 : vector<1x8x16x128xbf16> to vector<8x16x128xbf16>
    %22 = vector.shape_cast %19 : vector<8x16x128xbf16> to vector<1x8x16x128xbf16>
    tpu.vector_store %arg7[%c0_11, %c0_12, %c0_13, %c0_14], %22 {strides = array<i32>} : memref<1x8x16x128xbf16, #tpu.memory_space<vmem>>, vector<1x8x16x128xbf16>,
    return
  }
  func.func @transform_0(%arg0: i32, %arg1: i32, %arg2: i32) -> (i32, i32, i32, i32) {
    %c0_i32 = arith.constant 0 : i32
    %c0_i32_0 = arith.constant 0 : i32
    %c0_i32_1 = arith.constant 0 : i32
    return %arg0, %arg1, %c0_i32, %c0_i32_0 : i32, i32, i32, i32
  }
  func.func @transform_1(%arg0: i32, %arg1: i32, %arg2: i32) -> (i32, i32) {
    %c0_i32 = arith.constant 0 : i32
    %c0_i32_0 = arith.constant 0 : i32
    return %c0_i32, %arg2 : i32, i32
  }
  func.func @transform_2(%arg0: i32, %arg1: i32, %arg2: i32) -> (i32, i32) {
    %c0_i32 = arith.constant 0 : i32
    %c0_i32_0 = arith.constant 0 : i32
    return %c0_i32, %arg2 : i32, i32
  }
  func.func @transform_3(%arg0: i32, %arg1: i32, %arg2: i32) -> (i32, i32) {
    %c0_i32 = arith.constant 0 : i32
    %c0_i32_0 = arith.constant 0 : i32
    return %c0_i32, %arg2 : i32, i32
  }
  func.func @transform_4(%arg0: i32, %arg1: i32, %arg2: i32) -> (i32, i32, i32, i32) {
    %c0_i32 = arith.constant 0 : i32
    %c0_i32_0 = arith.constant 0 : i32
    return %arg0, %arg1, %c0_i32, %arg2 : i32, i32, i32, i32
  }
}

module attributes {stable_mosaic.version = 11 : i64} {
  func.func @_cbl_matmul_kernel(%arg0: i32, %arg1: i32, %arg2: i32, %arg3: memref<1x8x16x128xbf16, #tpu.memory_space<vmem>>, %arg4: memref<128x128xbf16, #tpu.memory_space<vmem>>, %arg5: memref<1x128xf32, #tpu.memory_space<vmem>>, %arg6: memref<1x128xf32, #tpu.memory_space<vmem>>, %arg7: memref<1x8x16x128xbf16, #tpu.memory_space<vmem>>) attributes {dimension_semantics = [#tpu.dimension_semantics<parallel>, #tpu.dimension_semantics<parallel>, #tpu.dimension_semantics<parallel>], iteration_bounds = array<i64: 2, 2, 1>, scalar_prefetch = 0 : i64, scratch_operands = 0 : i64, tpu.core_type = #tpu.core_type<tc>, window_params = [{transform_indices = @transform_0, window_bounds = array<i64: 1, 8, 16, 128>}, {transform_indices = @transform_1, window_bounds = array<i64: 128, 128>}, {transform_indices = @transform_2, window_bounds = array<i64: 1, 128>}, {transform_indices = @transform_3, window_bounds = array<i64: 1, 128>}, {transform_indices = @transform_4, window_bounds = array<i64: 1, 8, 16, 128>}]} {
    %c0 = arith.constant 0 : index
    %c0_0 = arith.constant 0 : index
    %c0_1 = arith.constant 0 : index
    %c0_2 = arith.constant 0 : index
    %0 = vector.load %arg3[%c0, %c0_0, %c0_1, %c0_2] : memref<1x8x16x128xbf16, #tpu.memory_space<vmem>>, vector<1x8x16x128xbf16>
    %1 = vector.shape_cast %0 : vector<1x8x16x128xbf16> to vector<8x16x128xbf16>
    %2 = vector.shape_cast %1 : vector<8x16x128xbf16> to vector<128x128xbf16>
    %c0_3 = arith.constant 0 : index
    %c0_4 = arith.constant 0 : index
    %3 = vector.load %arg4[%c0_3, %c0_4] : memref<128x128xbf16, #tpu.memory_space<vmem>>, vector<128x128xbf16>
    %cst = arith.constant dense<0.000000e+00> : vector<128x128xf32>
    %4 = tpu.matmul %2, %3, %cst {dimension_numbers = #tpu.dot_dimension_numbers<[1], [0], [0], [1], [0, 0, 1, 1], [], []>} : vector<128x128xbf16>, vector<128x128xbf16>, vector<128x128xf32> -> vector<128x128xf32>
    %c0_5 = arith.constant 0 : index
    %c0_6 = arith.constant 0 : index
    %5 = vector.load %arg5[%c0_5, %c0_6] : memref<1x128xf32, #tpu.memory_space<vmem>>, vector<1x128xf32>
    %6 = vector.broadcast %5 : vector<1x128xf32> to vector<128x128xf32>
    %7 = arith.mulf %4, %6 : vector<128x128xf32>
    %c0_7 = arith.constant 0 : index
    %c0_8 = arith.constant 0 : index
    %8 = vector.load %arg6[%c0_7, %c0_8] : memref<1x128xf32, #tpu.memory_space<vmem>>, vector<1x128xf32>
    %9 = vector.broadcast %8 : vector<1x128xf32> to vector<128x128xf32>
    %10 = arith.addf %7, %9 : vector<128x128xf32>
    %cst_9 = arith.constant 0.000000e+00 : f32
    %11 = vector.broadcast %cst_9 : f32 to vector<128x128xf32>
    %12 = arith.subf %11, %10 : vector<128x128xf32>
    %13 = math.exp %12 : vector<128x128xf32>
    %cst_10 = arith.constant 1.000000e+00 : f32
    %14 = vector.broadcast %cst_10 : f32 to vector<128x128xf32>
    %15 = arith.addf %14, %13 : vector<128x128xf32>
    %16 = tpu.reciprocal %15 {approx = true} : vector<128x128xf32> -> vector<128x128xf32>
    %17 = arith.mulf %10, %16 : vector<128x128xf32>
    %18 = vector.shape_cast %17 : vector<128x128xf32> to vector<8x16x128xf32>
    %19 = arith.truncf %18 : vector<8x16x128xf32> to vector<8x16x128xbf16>
    %c0_11 = arith.constant 0 : index
    %c0_12 = arith.constant 0 : index
    %c0_13 = arith.constant 0 : index
    %c0_14 = arith.constant 0 : index
    %20 = vector.load %arg7[%c0_11, %c0_12, %c0_13, %c0_14] : memref<1x8x16x128xbf16, #tpu.memory_space<vmem>>, vector<1x8x16x128xbf16>
    %21 = vector.shape_cast %20 : vector<1x8x16x128xbf16> to vector<8x16x128xbf16>
    %22 = vector.shape_cast %19 : vector<8x16x128xbf16> to vector<1x8x16x128xbf16>
    tpu.vector_store %arg7[%c0_11, %c0_12, %c0_13, %c0_14], %22 {strides = array<i32>} : memref<1x8x16x128xbf16, #tpu.memory_space<vmem>>, vector<1x8x16x128xbf16>,
    return
  }
  func.func @transform_0(%arg0: i32, %arg1: i32, %arg2: i32) -> (i32, i32, i32, i32) {
    %c0_i32 = arith.constant 0 : i32
    %c0_i32_0 = arith.constant 0 : i32
    %c0_i32_1 = arith.constant 0 : i32
    return %arg0, %arg1, %c0_i32, %c0_i32_0 : i32, i32, i32, i32
  }
  func.func @transform_1(%arg0: i32, %arg1: i32, %arg2: i32) -> (i32, i32) {
    %c0_i32 = arith.constant 0 : i32
    %c0_i32_0 = arith.constant 0 : i32
    return %c0_i32, %arg2 : i32, i32
  }
  func.func @transform_2(%arg0: i32, %arg1: i32, %arg2: i32) -> (i32, i32) {
    %c0_i32 = arith.constant 0 : i32
    %c0_i32_0 = arith.constant 0 : i32
    return %c0_i32, %arg2 : i32, i32
  }
  func.func @transform_3(%arg0: i32, %arg1: i32, %arg2: i32) -> (i32, i32) {
    %c0_i32 = arith.constant 0 : i32
    %c0_i32_0 = arith.constant 0 : i32
    return %c0_i32, %arg2 : i32, i32
  }
  func.func @transform_4(%arg0: i32, %arg1: i32, %arg2: i32) -> (i32, i32, i32, i32) {
    %c0_i32 = arith.constant 0 : i32
    %c0_i32_0 = arith.constant 0 : i32
    return %arg0, %arg1, %c0_i32, %arg2 : i32, i32, i32, i32
  }
}

</mosaic_0001>

<bundles_post_ra>
// kernel: tpu_custom_call.1
= control target key start
LH: loop header
LB: loop body
LE: loop exit
PB: predicated region body
PF: predicated region fallthrough
CT: control target
= control target key end

     0   :  { %s1628_s0 = inlined_call_operand.hbm [shape: bf16[2,16,16,128], index: 0, kind: input, shape index: {}]   ;;  %s1629_s1 = inlined_call_operand.hbm [shape: bf16[128,128], index: 1, kind: input, shape index: {}]   ;;  %s1630_s2 = inlined_call_operand.vmem [shape: f32[1,128], index: 2, kind: input, shape index: {}]   ;;  %s1631_s3 = inlined_call_operand.vmem [shape: f32[1,128], index: 3, kind: input, shape index: {}]   ;;  %s1632_s4 = inlined_call_operand.hbm [shape: bf16[2,16,16,128], index: 4, kind: output, shape index: {}]  }
   0x1   :  { %1642 = sst [smem:[#allocation16_spill]] %s1629_s1 }
   0x2   :  { %1643 = sst [smem:[#allocation17_spill]] %s1632_s4 }
   0x3   :  { %9 = vsyncpa [#allocation3], 0 }
   0x4   :  { %11 = vsyncpa [#allocation3 + $0x1], 0 }
   0x5   :  { %12 = vsyncpa [#allocation6], 0 }
   0x6   :  { %13 = vsyncpa [#allocation4], 0 }
   0x7   :  { %15 = vsyncpa [#allocation4 + $0x1], 0  ;;  %s1324_s15 = smov 0   ;;  %s1326_s16 = smov 0  }
   0x8   :  { %s1328_s17 = smov 0   ;;  %s1330_s18 = smov 0  }
   0x9   :  { %s1332_s19 = smov 0   ;;  %s1334_s20 = smov 0  }
   0xa   :  { %s1336_s21 = smov 0   ;;  %s1338_s22 = smov 0  }
   0xb LB: > { %1644 = sst [smem:[#allocation11_spill]] %s1264_s15  ;;  %s795_s23 = sadd.s32 4294967295, %s1292_s22   ;;  %s1292_s22 = sphi %s1338_s22, %s21_s22   ;;  %s1288_s21 = sphi %s1336_s21, %s1670_s21   ;;  %s1284_s20 = sphi %s1334_s20, %s1669_s20   ;;  %s1280_s19 = sphi %s1332_s19, %s1668_s19   ;;  %s1276_s18 = sphi %s1330_s18, %s1667_s18   ;;  %s1272_s17 = sphi %s1328_s17, %s1666_s17   ;;  %s1268_s16 = sphi %s1326_s16, %s1665_s16   ;;  %s1264_s15 = sphi %s1324_s15, %s1664_s15  }
   0xc   : > { %s796_s24 = sadd.s32 4294967294, %s1292_s22   ;;  %p62_p0 = scmp.ne.s32.totalorder %s1268_s16, %s1264_s15 }
   0xd   : > { %p1368_p1 = scmp.eq.s32.totalorder %s795_s23, 0  ;;  %p174_p2 = scmp.eq.s32.totalorder %s796_s24, 3 }
   0xe   : > { %p797_p4 = scmp.ge.s32.totalorder %s1292_s22, 1  ;;  %p181_p6 = scmp.lt.s32.totalorder %s1292_s22, 5 }
   0xf   : > { %p1374_p3 = por %p1368_p1, %p62_p0  ;;  %p1379_p5 = por %p174_p2, %p62_p0 }
  0x10   : > { %s1649_s1 = sld [smem:[#allocation16_spill]]  ;;  %p1387_p7 = pnand %p797_p4, %p181_p6 }
  0x11   : > { %s1647_s27 = scalar_select %p1379_p5, 1, 0 }
  0x12   : > { %p979_p8 = pneg %p1387_p7  ;;  %s1294_s6 = smov [#allocation5]  }
  0x13   : > { %1648 = sst [smem:[#allocation12_spill]] %s1647_s27  ;;  %s196_s7 = sshll.u32 %s1294_s6, 4  ;;  %s197_s7 = int_to_ptr.vmem [resolvable:$true] %s196_s7 }
  0x14   : > { %p980_p9 = pnand %p979_p8, %p1368_p1  ;;  %s1633_s8 = smov 64  }
  0x15   : > { %s1634_s9 = smov 4   ;;  %s36_s10 = sadd.s32 1, %s1284_s20 }
  0x16   : > { %s194_s30 = sshll.u32 %s1649_s1, 4  ;;  %p38_p10 = scmp.ge.s32.totalorder %s36_s10, 2  ;;  %s195_s30 = int_to_ptr.hbm [resolvable:$true] %s194_s30 }
  0x17   : > { %982 = dma.hbm_to_vmem [thread:$0]  (!%p980_p9), %s195_s30, 1024, %s197_s7, [#allocation6], %s1633_s8, %s1633_s8, %s1634_s9  }
  0x18   : > { %s40_s11 = sadd.s32 1, %s1288_s21  ;;  %p168_p11 = scmp.eq.s32.totalorder %s795_s23, 3 }
  0x19   : > { %p56_p12 = scmp.ne.s32.totalorder %s1272_s17, %s1268_s16  ;;  %s1672_s10 = smov (%p38_p10, %s36_s10), 0 }
  0x1a   : > { %1651 = sst [smem:[#allocation13_spill]] %s1672_s10  ;;  %s1674_s11 = smov (!%p38_p10, %s40_s11), %s1288_s21 }
  0x1b   : > { %s49_s12 = sadd.s32 1, %s1272_s17  ;;  %p57_p13 = scmp.eq.s32.totalorder %s1292_s22, 0 }
  0x1c   : > { %p42_p0 = scmp.ge.s32.totalorder %s1674_s11, 2  ;;  %p1407_p2 = por %p168_p11, %p56_p12 }
  0x1d   : > { %s45_s14 = ssub.s32 %s1284_s20, %s1672_s10  ;;  %p1413_p4 = por %p57_p13, %p56_p12 }
  0x1e   : > { %s1652_s13 = scalar_select %p1407_p2, 1, 0 }
  0x1f   : > { %s1676_s11 = smov (%p42_p0, %s1674_s11), 0  ;;  %p992_p6 = scmp.lt.s32.totalorder %s1292_s22, 4 }
  0x20   : > { %1653 = sst [smem:[#allocation14_spill]] %s1652_s13  ;;  %s222_s23 = sand.u32 1, %s1272_s17  }
  0x21   : > { %1655 = sst [smem:[#allocation15_spill]] %s1676_s11  ;;  %s44_s28 = ssub.s32 %s1288_s21, %s1676_s11 }
  0x22   : > { %s882_s29 = sshll.u32 %s1284_s20, 4  ;;  %s46_s30 = sor.u32 %s45_s14, %s44_s28 }
  0x23   : > { %s802_s6 = sshll.u32 %s222_s23, 6  ;;  %p47_p8 = scmp.eq.s32.totalorder %s46_s30, 0 }
  0x24   : > { %s805_s7 = sshll.u32 %s1288_s21, 5  ;;  %s226_s8 = scalar_lea.vmem [#allocation2], %s802_s6 }
  0x25   : > { %s237_s9 = sshll.u32 %s226_s8, 4  ;;  %s232_s10 = sadd.s32 %s882_s29, %s805_s7  ;;  %s238_s9 = int_to_ptr.vmem [resolvable:$true] %s237_s9 }
  0x26   : > { %s1426_s1 = scalar_select %p47_p8, %s1272_s17, %s49_s12  }
  0x27   : > { %s806_s27 = sshll.u32 %s232_s10, 2  ;;  %p984_p9 = pnand %p992_p6, %p1413_p4 }
  0x28   : > { %s234_s4 = scalar_lea.hbm %s1628_s0, %s806_s27  ;;  %s223_s14 = scalar_lea.sflag [#allocation3], %s222_s23 }
  0x29   : > { %s235_s11 = sshll.u32 %s234_s4, 4  ;;  %s1656_s28 = smov 4   ;;  %s236_s11 = int_to_ptr.hbm [resolvable:$true] %s235_s11 }
  0x2a   : > { %s1657_s30 = smov 64   ;;  %249 = sbr.rel (%p1387_p7) target bundleno = 276 (0x114), region = 36 }
  0x2b   : > { %986 = dma.hbm_to_vmem [thread:$0]  (!%p984_p9), %s236_s11, 1024, %s238_s9, %s223_s14, %s1657_s30, %s1657_s30, %s1656_s28  }
  0x2c   : > { %s1441_s8 = sand.u32 (!%p1387_p7), 1, %s1268_s16  }
  0x2d   : > { %s808_s15 = sshll.u32 (!%p1387_p7), %s1441_s8, 6  ;;  %s252_s27 = scalar_lea.sflag (!%p1387_p7), [#allocation3], %s1441_s8 }
  0x2e   : > { %s1447_s4 = scalar_lea.vmem (!%p1387_p7), [#allocation2], %s808_s15 }
  0x2f   : > { %1251 = dma.done.wait (%p1374_p3), %s252_s27, 1024  }
  0x30   : > { %1253 = vsyncadd (%p1374_p3), %s252_s27, 4294966272 }
  0x31   : > { %1255 = dma.done.wait (%p1368_p1), [#allocation6], 1024  }
  0x32   : > { %1257 = vsyncadd (%p1368_p1), [#allocation6], 4294966272  ;;  %v898_v0 = vld [vmem:[#allocation5 + $0x38] sm:$0xff]  ;;  %v897_v1 = vld [vmem:[#allocation5 + $0x30] sm:$0xff]  ;;  %s1562_s10 = scalar_lea.vmem [#allocation7], %s808_s15  ;;  %s899_s11 = sshll.u32 %s1276_s18, 4 }
  0x33   : > { %428 = vmatpush.bf16.msra.mxu0 %v898_v0  ;;  %947 = vmatpush.bf16.msra.mxu1 %v898_v0  ;;  %v896_v2 = vld [vmem:[#allocation5 + $0x28] sm:$0xff]  ;;  %v895_v3 = vld [vmem:[#allocation5 + $0x20] sm:$0xff]  ;;  %v894_v4 = vld [vmem:[#allocation5 + $0x18] sm:$0xff]  ;;  %s878_s12 = sshll.u32 %s1280_s19, 5  ;;  %s1658_s23 = sld [smem:[#allocation17_spill]] }
  0x34   : > { %948 = vmatpush.bf16.msra.mxu2 %v898_v0  ;;  %949 = vmatpush.bf16.msra.mxu3 %v898_v0  ;;  %v893_v5 = vld [vmem:[#allocation5 + $0x10] sm:$0xff]  ;;  %v892_v6 = vld [vmem:[#allocation5 + $0x8] sm:$0xff]  ;;  %v891_v7 = vld [vmem:[#allocation5] sm:$0xff]  ;;  %s659_s13 = sadd.s32 %s899_s11, %s878_s12  ;;  %s662_s6 = sshll.u32 %s1562_s10, 4  ;;  %s663_s6 = int_to_ptr.vmem [resolvable:$true] %s662_s6 }
  0x35   : > { %v883_v8 = vld [vmem:[%s1447_s4] sm:$0xff]  ;;  %v885_v9 = vld [vmem:[%s1447_s4 + $0x10] sm:$0xff]  ;;  %v884_v12 = vld [vmem:[%s1447_s4 + $0x8] sm:$0xff]  ;;  %s879_s18 = sshll.u32 %s659_s13, 2  ;;  %s646_s28 = scalar_lea.sflag [#allocation4], %s1441_s8 }
  0x36   : > { %v887_v10 = vld [vmem:[%s1447_s4 + $0x20] sm:$0xff]  ;;  %v889_v11 = vld [vmem:[%s1447_s4 + $0x30] sm:$0xff]  ;;  %v886_v13 = vld [vmem:[%s1447_s4 + $0x18] sm:$0xff] }
  0x37   : > { %429 = vmatpush.bf16.msra.mxu0 %v897_v1  ;;  %950 = vmatpush.bf16.msra.mxu1 %v897_v1  ;;  %v888_v14 = vld [vmem:[%s1447_s4 + $0x28] sm:$0xff]  ;;  %v890_v15 = vld [vmem:[%s1447_s4 + $0x38] sm:$0xff]  ;;  %v1468_v16 = vld [vmem:[%s1630_s2] ss:$0 sm:$0xff] }
  0x38   : > { %951 = vmatpush.bf16.msra.mxu2 %v897_v1  ;;  %952 = vmatpush.bf16.msra.mxu3 %v897_v1  ;;  %v1473_v17 = vld [vmem:[%s1631_s3] ss:$0 sm:$0xff] }
  0x39   : > { %s661_s29 = scalar_lea.hbm %s1658_s23, %s879_s18  ;;  %s1210_s25 = scalar_lea.hbm %s1658_s23, 256 }
  0x3a   : > { %s664_s14 = sshll.u32 %s661_s29, 4  ;;  %s665_s14 = int_to_ptr.hbm [resolvable:$true] %s664_s14 }
  0x3b   : > { %430 = vmatpush.bf16.msra.mxu0 %v896_v2  ;;  %953 = vmatpush.bf16.msra.mxu1 %v896_v2  ;;  %s1204_s30 = sshra.s32 %s665_s14, 4  ;;  %s1205_s30 = int_to_ptr.hbm [resolvable:$true] %s1204_s30 }
  0x3c   : > { %954 = vmatpush.bf16.msra.mxu2 %v896_v2  ;;  %955 = vmatpush.bf16.msra.mxu3 %v896_v2  ;;  %s1206_s15 = scalar_lea.hbm %s1205_s30, 64  ;;  %p1211_p10 = scmp.lt.s32.totalorder %s1205_s30, %s1658_s23 }
  0x3d   : > { %p1207_p1 = scmp.ne.s32.totalorder %s1205_s30, %s1206_s15  ;;  %p1212_p11 = scmp.lt.s32.totalorder %s1210_s25, %s1206_s15 }
  0x3f   : > { %431 = vmatpush.bf16.msra.mxu0 %v895_v3  ;;  %956 = vmatpush.bf16.msra.mxu1 %v895_v3  ;;  %p1208_p3 = pnand %p1207_p1, %p1407_p2  ;;  %p1213_p12 = por %p1212_p11, %p1211_p10 }
  0x40   : > { %957 = vmatpush.bf16.msra.mxu2 %v895_v3  ;;  %958 = vmatpush.bf16.msra.mxu3 %v895_v3 }
  0x41   : > { %p1209_p7 = pneg %p1208_p3 }
  0x43   : > { %432 = vmatpush.bf16.msra.mxu0 %v894_v4  ;;  %959 = vmatpush.bf16.msra.mxu1 %v894_v4  ;;  %p1214_p13 = pnand %p1213_p12, %p1209_p7 }
  0x44   : > { %960 = vmatpush.bf16.msra.mxu2 %v894_v4  ;;  %961 = vmatpush.bf16.msra.mxu3 %v894_v4 }
  0x47   : > { %433 = vmatpush.bf16.msra.mxu0 %v893_v5  ;;  %962 = vmatpush.bf16.msra.mxu1 %v893_v5 }
  0x48   : > { %963 = vmatpush.bf16.msra.mxu2 %v893_v5  ;;  %964 = vmatpush.bf16.msra.mxu3 %v893_v5 }
  0x4b   : > { %434 = vmatpush.bf16.msra.mxu0 %v892_v6  ;;  %965 = vmatpush.bf16.msra.mxu1 %v892_v6 }
  0x4c   : > { %966 = vmatpush.bf16.msra.mxu2 %v892_v6  ;;  %967 = vmatpush.bf16.msra.mxu3 %v892_v6 }
  0x4f   : > { %435 = vmatpush.bf16.msra.mxu0 %v891_v7  ;;  %968 = vmatpush.bf16.msra.mxu1 %v891_v7 }
  0x50   : > { %969 = vmatpush.bf16.msra.mxu2 %v891_v7  ;;  %970 = vmatpush.bf16.msra.mxu3 %v891_v7 }
  0x52   : > { %436 = vmatmul.bf16.vlgmr.msra.gmra.mxu0 %v883_v8  ;;  %446 = vmatmul.bf16.vlgmr.msra.gmra.mxu1 %v885_v9 }
  0x53   : > { %456 = vmatmul.bf16.vlgmr.msra.gmra.mxu2 %v887_v10  ;;  %466 = vmatmul.bf16.vlgmr.msra.gmra.mxu3 %v889_v11 }
  0x62   : > { %441 = vmatmul.bf16.gmra.mxu0 %v884_v12  ;;  %451 = vmatmul.bf16.gmra.mxu1 %v886_v13 }
  0x63   : > { %461 = vmatmul.bf16.gmra.mxu2 %v888_v14  ;;  %471 = vmatmul.bf16.gmra.mxu3 %v890_v15 }
  0xcf   : > { %v437_v18 = vpop.f32.mrf.mxu0  ;;  %v447_v19 = vpop.f32.mrf.mxu1 }
  0xd0   : > { %v481_v20 = vmul.f32 %v1468_v16, %v437_v18  ;;  %v485_v21 = vmul.f32 %v1468_v16, %v447_v19 }
  0xd2   : > { %v1478_v22 = vadd.f32 %v1473_v17, %v481_v20  ;;  %v1481_v23 = vadd.f32 %v1473_v17, %v485_v21 }
  0xd4   : > { %v517_v24 = vsub.f32 0.0, %v1478_v22  ;;  %v521_v25 = vsub.f32 0.0, %v1481_v23 }
  0xd6   : > { %v533_v26 = vmul.f32 1.442695, %v517_v24  ;;  %v457_v27 = vpop.f32.mrf.mxu2  ;;  %v467_v28 = vpop.f32.mrf.mxu3  ;;  %v541_v29 = vmul.f32 1.442695, %v521_v25 }
  0xd7   : > { %v489_v30 = vmul.f32 %v1468_v16, %v457_v27  ;;  %v493_v31 = vmul.f32 %v1468_v16, %v467_v28  ;;  %v439_v32 = vpop.f32.mrf.mxu0  ;;  %v449_v33 = vpop.f32.mrf.mxu1 }
  0xd8   : > { %v482_v34 = vmul.f32 %v1468_v16, %v439_v32  ;;  %v486_v35 = vmul.f32 %v1468_v16, %v449_v33  ;;  %1066 = vpow2.f32 %v533_v26 }
  0xd9   : > { %v1490_v36 = vadd.f32 %v1473_v17, %v489_v30  ;;  %v1493_v37 = vadd.f32 %v1473_v17, %v493_v31  ;;  %1068 = vpow2.f32 %v541_v29 }
  0xda   : > { %v1496_v38 = vadd.f32 %v1473_v17, %v482_v34  ;;  %v1499_v39 = vadd.f32 %v1473_v17, %v486_v35 }
  0xdb   : > { %v525_v40 = vsub.f32 0.0, %v1490_v36  ;;  %v529_v41 = vsub.f32 0.0, %v1493_v37 }
  0xdc   : > { %v518_v42 = vsub.f32 0.0, %v1496_v38  ;;  %v522_v43 = vsub.f32 0.0, %v1499_v39 }
  0xdd   : > { %v549_v44 = vmul.f32 1.442695, %v525_v40  ;;  %v557_v45 = vmul.f32 1.442695, %v529_v41 }
  0xde   : > { %v459_v46 = vpop.f32.mrf.mxu2  ;;  %v469_v47 = vpop.f32.mrf.mxu3  ;;  %v535_v49 = vmul.f32 1.442695, %v518_v42  ;;  %v543_v54 = vmul.f32 1.442695, %v522_v43 }
  0xdf   : > { %v1067_v48 = vpop.eup %1066  ;;  %1070 = vpow2.f32 %v549_v44  ;;  %v490_v50 = vmul.f32 %v1468_v16, %v459_v46  ;;  %v494_v51 = vmul.f32 %v1468_v16, %v469_v47  ;;  %v442_v52 = vpop.f32.mrf.mxu0 }
  0xe0   : > { %v452_v53 = vpop.f32.mrf.mxu1  ;;  %v483_v55 = vmul.f32 %v1468_v16, %v442_v52  ;;  %v1069_v57 = vpop.eup %1068  ;;  %v565_v60 = vadd.f32 1.0, %v1067_v48  ;;  %1072 = vpow2.f32 %v557_v45 }
  0xe1   : > { %v487_v56 = vmul.f32 %v1468_v16, %v452_v53  ;;  %v1510_v58 = vadd.f32 %v1473_v17, %v490_v50  ;;  %v1513_v59 = vadd.f32 %v1473_v17, %v494_v51  ;;  %1074 = vpow2.f32 %v535_v49 }
  0xe2   : > { %v1516_v61 = vadd.f32 %v1473_v17, %v483_v55  ;;  %v569_v1 = vadd.f32 1.0, %v1069_v57  ;;  %1076 = vpow2.f32 %v543_v54 }
  0xe3   : > { %v1519_v62 = vadd.f32 %v1473_v17, %v487_v56  ;;  %v526_v63 = vsub.f32 0.0, %v1510_v58  ;;  %v530_v0 = vsub.f32 0.0, %v1513_v59  ;;  %1078 = vrcp.f32 %v565_v60 }
  0xe4   : > { %v519_v2 = vsub.f32 0.0, %v1516_v61 }
  0xe5   : > { %v1071_v3 = vpop.eup %1070  ;;  %v551_v4 = vmul.f32 1.442695, %v526_v63  ;;  %v523_v5 = vsub.f32 0.0, %v1519_v62  ;;  %v559_v7 = vmul.f32 1.442695, %v530_v0 }
  0xe6   : > { %v573_v6 = vadd.f32 1.0, %v1071_v3  ;;  %v462_v8 = vpop.f32.mrf.mxu2  ;;  %v472_v9 = vpop.f32.mrf.mxu3  ;;  %v537_v10 = vmul.f32 1.442695, %v519_v2 }
  0xe7   : > { %1080 = vpow2.f32 %v551_v4  ;;  %v491_v11 = vmul.f32 %v1468_v16, %v462_v8  ;;  %v495_v12 = vmul.f32 %v1468_v16, %v472_v9  ;;  %v444_v13 = vpop.f32.mrf.mxu0  ;;  %v1073_v15 = vpop.eup %1072  ;;  %v545_v21 = vmul.f32 1.442695, %v523_v5 }
  0xe8   : > { %v454_v14 = vpop.f32.mrf.mxu1  ;;  %1082 = vrcp.f32 %v569_v1  ;;  %v484_v18 = vmul.f32 %v1468_v16, %v444_v13  ;;  %v1075_v20 = vpop.eup %1074  ;;  %v577_v30 = vadd.f32 1.0, %v1073_v15 }
  0xe9   : > { %v488_v19 = vmul.f32 %v1468_v16, %v454_v14  ;;  %1084 = vrcp.f32 %v573_v6  ;;  %v1530_v24 = vadd.f32 %v1473_v17, %v491_v11  ;;  %v1533_v25 = vadd.f32 %v1473_v17, %v495_v12  ;;  %v1077_v26 = vpop.eup %1076 }
  0xea   : > { %v566_v27 = vadd.f32 1.0, %v1075_v20  ;;  %1086 = vpow2.f32 %v559_v7  ;;  %v1536_v28 = vadd.f32 %v1473_v17, %v484_v18  ;;  %v570_v31 = vadd.f32 1.0, %v1077_v26  ;;  %v1079_v33 = vpop.eup %1078 }
  0xeb   : > { %v1539_v29 = vadd.f32 %v1473_v17, %v488_v19  ;;  %1088 = vpow2.f32 %v537_v10  ;;  %v527_v32 = vsub.f32 0.0, %v1530_v24  ;;  %v531_v44 = vsub.f32 0.0, %v1533_v25 }
  0xec   : > { %1090 = vrcp.f32 %v566_v27  ;;  %v520_v34 = vsub.f32 0.0, %v1536_v28  ;;  %v597_v0 = vmul.f32 %v1079_v33, %v1478_v22 }
  0xed   : > { %v524_v35 = vsub.f32 0.0, %v1539_v29  ;;  %v1081_v40 = vpop.eup %1080  ;;  %1092 = vrcp.f32 %v570_v31  ;;  %v553_v41 = vmul.f32 1.442695, %v527_v32  ;;  %v561_v60 = vmul.f32 1.442695, %v531_v44 }
  0xee   : > { %v1083_v42 = vpop.eup %1082  ;;  %v574_v43 = vadd.f32 1.0, %v1081_v40  ;;  %1094 = vpow2.f32 %v545_v21  ;;  %v539_v45 = vmul.f32 1.442695, %v520_v34  ;;  %v464_v46 = vpop.f32.mrf.mxu2 }
  0xef   : > { %v474_v47 = vpop.f32.mrf.mxu3  ;;  %v1085_v48 = vpop.eup %1084  ;;  %1096 = vrcp.f32 %v577_v30  ;;  %v492_v49 = vmul.f32 %v1468_v16, %v464_v46  ;;  %v547_v52 = vmul.f32 1.442695, %v524_v35  ;;  %v601_v3 = vmul.f32 %v1083_v42, %v1481_v23 }
  0xf0   : > { %v496_v50 = vmul.f32 %v1468_v16, %v474_v47  ;;  %v1087_v51 = vpop.eup %1086  ;;  %1098 = vrcp.f32 %v574_v43  ;;  %v605_v11 = vmul.f32 %v1085_v48, %v1490_v36 }
  0xf1   : > { %v1089_v53 = vpop.eup %1088  ;;  %v578_v54 = vadd.f32 1.0, %v1087_v51  ;;  %1100 = vpow2.f32 %v553_v41  ;;  %v1548_v55 = vadd.f32 %v1473_v17, %v492_v49 }
  0xf2   : > { %v1551_v56 = vadd.f32 %v1473_v17, %v496_v50  ;;  %v1091_v57 = vpop.eup %1090  ;;  %1102 = vpow2.f32 %v539_v45  ;;  %v567_v5 = vadd.f32 1.0, %v1089_v53 }
  0xf3   : > { %v1093_v63 = vpop.eup %1092  ;;  %v598_v16 = vmul.f32 %v1091_v57, %v1496_v38  ;;  %1104 = vrcp.f32 %v578_v54  ;;  %v528_v1 = vsub.f32 0.0, %v1548_v55 }
  0xf4   : > { %v1095_v2 = vpop.eup %1094  ;;  %v602_v4 = vmul.f32 %v1093_v63, %v1499_v39  ;;  %v532_v17 = vsub.f32 0.0, %v1551_v56  ;;  %1106 = vpow2.f32 %v547_v52 }
  0xf5   : > { %v1097_v6 = vpop.eup %1096  ;;  %v903_v7 = vpack.c.bf16 %v598_v16, %v597_v0  ;;  %v555_v8 = vmul.f32 1.442695, %v528_v1  ;;  %v571_v10 = vadd.f32 1.0, %v1095_v2  ;;  %1108 = vpow2.f32 %v561_v60 }
  0xf6   : > { %v1099_v9 = vpop.eup %1098  ;;  %v913_v22 = vpack.c.bf16 %v602_v4, %v601_v3  ;;  %1110 = vrcp.f32 %v567_v5  ;;  %v563_v12 = vmul.f32 1.442695, %v532_v17  ;;  %v609_v36 = vmul.f32 %v1097_v6, %v1493_v37 }
  0xf7   : > { %v1101_v38 = vpop.eup %1100  ;;  %904 = vst [vmem:[%s1562_s10] sm:$0xff] %v903_v7   ;;  %v606_v23 = vmul.f32 %v1099_v9, %v1510_v58  ;;  %1112 = vpow2.f32 %v555_v8 }
  0xf8   : > { %v1103_v39 = vpop.eup %1102  ;;  %941 = vst [vmem:[%s1562_s10 + $0x10] sm:$0xff] %v913_v22   ;;  %1114 = vrcp.f32 %v571_v10  ;;  %v575_v21 = vadd.f32 1.0, %v1101_v38 }
  0xf9   : > { %v1105_v13 = vpop.eup %1104  ;;  %v923_v14 = vpack.c.bf16 %v606_v23, %v605_v11  ;;  %v568_v15 = vadd.f32 1.0, %v1103_v39 }
  0xfa   : > { %v610_v18 = vmul.f32 %v1105_v13, %v1513_v59  ;;  %v1107_v19 = vpop.eup %1106 }
  0xfb   : > { %943 = vst [vmem:[%s1562_s10 + $0x20] sm:$0xff] %v923_v14   ;;  %1116 = vrcp.f32 %v568_v15  ;;  %v1109_v58 = vpop.eup %1108  ;;  %v572_v26 = vadd.f32 1.0, %v1107_v19 }
  0xfc   : > { %v933_v20 = vpack.c.bf16 %v610_v18, %v609_v36  ;;  %1118 = vpow2.f32 %v563_v12  ;;  %v1111_v27 = vpop.eup %1110  ;;  %v579_v31 = vadd.f32 1.0, %v1109_v58 }
  0xfd   : > { %1120 = vrcp.f32 %v572_v26  ;;  %v1113_v30 = vpop.eup %1112  ;;  %v599_v34 = vmul.f32 %v1111_v27, %v1516_v61 }
  0xfe   : > { %945 = vst [vmem:[%s1562_s10 + $0x30] sm:$0xff] %v933_v20   ;;  %v1115_v32 = vpop.eup %1114  ;;  %1122 = vrcp.f32 %v575_v21  ;;  %v576_v37 = vadd.f32 1.0, %v1113_v30 }
  0xff   : > { %v603_v43 = vmul.f32 %v1115_v32, %v1519_v62 }
 0x100   : > { %1124 = vrcp.f32 %v576_v37 }
 0x101   : > { %v1117_v59 = vpop.eup %1116  ;;  %1126 = vrcp.f32 %v579_v31 }
 0x102   : > { %v1119_v33 = vpop.eup %1118  ;;  %v600_v35 = vmul.f32 %v1117_v59, %v1536_v28 }
 0x103   : > { %v580_v40 = vadd.f32 1.0, %v1119_v33  ;;  %v1121_v41 = vpop.eup %1120 }
 0x104   : > { %v908_v42 = vpack.c.bf16 %v600_v35, %v599_v34  ;;  %v604_v44 = vmul.f32 %v1121_v41, %v1539_v29  ;;  %v1123_v45 = vpop.eup %1122 }
 0x105   : > { %1128 = vrcp.f32 %v580_v40  ;;  %v607_v47 = vmul.f32 %v1123_v45, %v1530_v24 }
 0x106   : > { %940 = vst [vmem:[%s1562_s10 + $0x8] sm:$0xff] %v908_v42   ;;  %v918_v46 = vpack.c.bf16 %v604_v44, %v603_v43  ;;  %v1125_v61 = vpop.eup %1124 }
 0x107   : > { %v1127_v28 = vpop.eup %1126  ;;  %v608_v62 = vmul.f32 %v1125_v61, %v1548_v55 }
 0x108   : > { %942 = vst [vmem:[%s1562_s10 + $0x18] sm:$0xff] %v918_v46   ;;  %v611_v49 = vmul.f32 %v1127_v28, %v1533_v25 }
 0x109   : > { %v928_v48 = vpack.c.bf16 %v608_v62, %v607_v47 }
 0x10b   : > { %v1129_v29 = vpop.eup %1128  ;;  %944 = vst [vmem:[%s1562_s10 + $0x28] sm:$0xff] %v928_v48  }
 0x10c   : > { %v612_v50 = vmul.f32 %v1129_v29, %v1551_v56 }
 0x10e   : > { %v938_v51 = vpack.c.bf16 %v612_v50, %v611_v49 }
 0x110   : > { %946 = vst [vmem:[%s1562_s10 + $0x38] sm:$0xff] %v938_v51  }
 0x111   : > { %1217 = shalt.err (!%p1214_p13)
}
 0x112   : > { %s1297_s8 = smov 64   ;;  %s1298_s9 = smov 4  }
 0x113   : > { %977 = dma.vmem_to_hbm [thread:$0]  (%p1407_p2), %s663_s6, 1024, %s665_s14, %s646_s28, %s1297_s8, %s1297_s8, %s1298_s9  }
 0x114 PF: > { %s1660_s10 = sld [smem:[#allocation11_spill]]  ;;  %p994_p0 = scmp.ge.s32.totalorder %s1292_s22, 2 }
 0x116   : > { %p988_p4 = pnand %p994_p0, %p1379_p5 }
 0x118   : > { %p989_p6 = pneg %p988_p4 }
 0x11a   : > { %s679_s12 = sand.u32 1, %s1660_s10  }
 0x11b   : > { %s680_s13 = scalar_lea.sflag [#allocation4], %s679_s12 }
 0x11c   : > { %1259 = dma.done.wait (%p989_p6), %s680_s13, 1024  }
 0x11d   : > { %1261 = vsyncadd (%p989_p6), %s680_s13, 4294966272  ;;  %s21_s22 = sadd.s32 1, %s1292_s22   ;;  %s1662_s24 = sld [smem:[#allocation13_spill]] }
 0x11e   : > { %p18_p8 = scmp.ge.s32.totalorder %s21_s22, 6   ;;  %s1663_s29 = sld [smem:[#allocation15_spill]] }
 0x11f   : > { %s1664_s15 = smov %s1268_s16  ;;  %s1665_s16 = smov %s1272_s17 }
 0x120   : > { %s1666_s17 = smov %s1426_s1  ;;  %s1667_s18 = smov %s1284_s20 }
 0x121   : > { %s1668_s19 = smov %s1288_s21  ;;  %20 = sbr.rel (!%p18_p8) target bundleno = 11 (0xb), region = 92 }
 0x123   : > { %s1669_s20 = smov %s1662_s24 }
 0x124   : > { %s1670_s21 = smov %s1663_s29 }
 0x126   :  { %686 = vsyncpa [#allocation3], 1 }
 0x127   :  { %688 = vsyncpa [#allocation3 + $0x1], 1 }
 0x128   :  { %689 = vsyncpa [#allocation6], 1 }
 0x129   :  { %690 = vsyncpa [#allocation4], 1 }
 0x12a   :  { %692 = vsyncpa [#allocation4 + $0x1], 1 }

// kernel: tpu_custom_call.1
= control target key start
LH: loop header
LB: loop body
LE: loop exit
PB: predicated region body
PF: predicated region fallthrough
CT: control target
= control target key end

     0   :  { %s1628_s0 = inlined_call_operand.hbm [shape: bf16[2,16,16,128], index: 0, kind: input, shape index: {}]   ;;  %s1629_s1 = inlined_call_operand.hbm [shape: bf16[128,128], index: 1, kind: input, shape index: {}]   ;;  %s1630_s2 = inlined_call_operand.vmem [shape: f32[1,128], index: 2, kind: input, shape index: {}]   ;;  %s1631_s3 = inlined_call_operand.vmem [shape: f32[1,128], index: 3, kind: input, shape index: {}]   ;;  %s1632_s4 = inlined_call_operand.hbm [shape: bf16[2,16,16,128], index: 4, kind: output, shape index: {}]  }
   0x1   :  { %1642 = sst [smem:[#allocation16_spill]] %s1629_s1 }
   0x2   :  { %1643 = sst [smem:[#allocation17_spill]] %s1632_s4 }
   0x3   :  { %9 = vsyncpa [#allocation3], 0 }
   0x4   :  { %11 = vsyncpa [#allocation3 + $0x1], 0 }
   0x5   :  { %12 = vsyncpa [#allocation6], 0 }
   0x6   :  { %13 = vsyncpa [#allocation4], 0 }
   0x7   :  { %15 = vsyncpa [#allocation4 + $0x1], 0  ;;  %s1324_s15 = smov 0   ;;  %s1326_s16 = smov 0  }
   0x8   :  { %s1328_s17 = smov 0   ;;  %s1330_s18 = smov 0  }
   0x9   :  { %s1332_s19 = smov 0   ;;  %s1334_s20 = smov 0  }
   0xa   :  { %s1336_s21 = smov 0   ;;  %s1338_s22 = smov 0  }
   0xb LB: > { %1644 = sst [smem:[#allocation11_spill]] %s1264_s15  ;;  %s795_s23 = sadd.s32 4294967295, %s1292_s22   ;;  %s1292_s22 = sphi %s1338_s22, %s21_s22   ;;  %s1288_s21 = sphi %s1336_s21, %s1670_s21   ;;  %s1284_s20 = sphi %s1334_s20, %s1669_s20   ;;  %s1280_s19 = sphi %s1332_s19, %s1668_s19   ;;  %s1276_s18 = sphi %s1330_s18, %s1667_s18   ;;  %s1272_s17 = sphi %s1328_s17, %s1666_s17   ;;  %s1268_s16 = sphi %s1326_s16, %s1665_s16   ;;  %s1264_s15 = sphi %s1324_s15, %s1664_s15  }
   0xc   : > { %s796_s24 = sadd.s32 4294967294, %s1292_s22   ;;  %p62_p0 = scmp.ne.s32.totalorder %s1268_s16, %s1264_s15 }
   0xd   : > { %p1368_p1 = scmp.eq.s32.totalorder %s795_s23, 0  ;;  %p174_p2 = scmp.eq.s32.totalorder %s796_s24, 3 }
   0xe   : > { %p797_p4 = scmp.ge.s32.totalorder %s1292_s22, 1  ;;  %p181_p6 = scmp.lt.s32.totalorder %s1292_s22, 5 }
   0xf   : > { %p1374_p3 = por %p1368_p1, %p62_p0  ;;  %p1379_p5 = por %p174_p2, %p62_p0 }
  0x10   : > { %s1649_s1 = sld [smem:[#allocation16_spill]]  ;;  %p1387_p7 = pnand %p797_p4, %p181_p6 }
  0x11   : > { %s1647_s27 = scalar_select %p1379_p5, 1, 0 }
  0x12   : > { %p979_p8 = pneg %p1387_p7  ;;  %s1294_s6 = smov [#allocation5]  }
  0x13   : > { %1648 = sst [smem:[#allocation12_spill]] %s1647_s27  ;;  %s196_s7 = sshll.u32 %s1294_s6, 4  ;;  %s197_s7 = int_to_ptr.vmem [resolvable:$true] %s196_s7 }
  0x14   : > { %p980_p9 = pnand %p979_p8, %p1368_p1  ;;  %s1633_s8 = smov 64  }
  0x15   : > { %s1634_s9 = smov 4   ;;  %s36_s10 = sadd.s32 1, %s1284_s20 }
  0x16   : > { %s194_s30 = sshll.u32 %s1649_s1, 4  ;;  %p38_p10 = scmp.ge.s32.totalorder %s36_s10, 2  ;;  %s195_s30 = int_to_ptr.hbm [resolvable:$true] %s194_s30 }
  0x17   : > { %982 = dma.hbm_to_vmem [thread:$0]  (!%p980_p9), %s195_s30, 1024, %s197_s7, [#allocation6], %s1633_s8, %s1633_s8, %s1634_s9  }
  0x18   : > { %s40_s11 = sadd.s32 1, %s1288_s21  ;;  %p168_p11 = scmp.eq.s32.totalorder %s795_s23, 3 }
  0x19   : > { %p56_p12 = scmp.ne.s32.totalorder %s1272_s17, %s1268_s16  ;;  %s1672_s10 = smov (%p38_p10, %s36_s10), 0 }
  0x1a   : > { %1651 = sst [smem:[#allocation13_spill]] %s1672_s10  ;;  %s1674_s11 = smov (!%p38_p10, %s40_s11), %s1288_s21 }
  0x1b   : > { %s49_s12 = sadd.s32 1, %s1272_s17  ;;  %p57_p13 = scmp.eq.s32.totalorder %s1292_s22, 0 }
  0x1c   : > { %p42_p0 = scmp.ge.s32.totalorder %s1674_s11, 2  ;;  %p1407_p2 = por %p168_p11, %p56_p12 }
  0x1d   : > { %s45_s14 = ssub.s32 %s1284_s20, %s1672_s10  ;;  %p1413_p4 = por %p57_p13, %p56_p12 }
  0x1e   : > { %s1652_s13 = scalar_select %p1407_p2, 1, 0 }
  0x1f   : > { %s1676_s11 = smov (%p42_p0, %s1674_s11), 0  ;;  %p992_p6 = scmp.lt.s32.totalorder %s1292_s22, 4 }
  0x20   : > { %1653 = sst [smem:[#allocation14_spill]] %s1652_s13  ;;  %s222_s23 = sand.u32 1, %s1272_s17  }
  0x21   : > { %1655 = sst [smem:[#allocation15_spill]] %s1676_s11  ;;  %s44_s28 = ssub.s32 %s1288_s21, %s1676_s11 }
  0x22   : > { %s882_s29 = sshll.u32 %s1284_s20, 4  ;;  %s46_s30 = sor.u32 %s45_s14, %s44_s28 }
  0x23   : > { %s802_s6 = sshll.u32 %s222_s23, 6  ;;  %p47_p8 = scmp.eq.s32.totalorder %s46_s30, 0 }
  0x24   : > { %s805_s7 = sshll.u32 %s1288_s21, 5  ;;  %s226_s8 = scalar_lea.vmem [#allocation2], %s802_s6 }
  0x25   : > { %s237_s9 = sshll.u32 %s226_s8, 4  ;;  %s232_s10 = sadd.s32 %s882_s29, %s805_s7  ;;  %s238_s9 = int_to_ptr.vmem [resolvable:$true] %s237_s9 }
  0x26   : > { %s1426_s1 = scalar_select %p47_p8, %s1272_s17, %s49_s12  }
  0x27   : > { %s806_s27 = sshll.u32 %s232_s10, 2  ;;  %p984_p9 = pnand %p992_p6, %p1413_p4 }
  0x28   : > { %s234_s4 = scalar_lea.hbm %s1628_s0, %s806_s27  ;;  %s223_s14 = scalar_lea.sflag [#allocation3], %s222_s23 }
  0x29   : > { %s235_s11 = sshll.u32 %s234_s4, 4  ;;  %s1656_s28 = smov 4   ;;  %s236_s11 = int_to_ptr.hbm [resolvable:$true] %s235_s11 }
  0x2a   : > { %s1657_s30 = smov 64   ;;  %249 = sbr.rel (%p1387_p7) target bundleno = 276 (0x114), region = 36 }
  0x2b   : > { %986 = dma.hbm_to_vmem [thread:$0]  (!%p984_p9), %s236_s11, 1024, %s238_s9, %s223_s14, %s1657_s30, %s1657_s30, %s1656_s28  }
  0x2c   : > { %s1441_s8 = sand.u32 (!%p1387_p7), 1, %s1268_s16  }
  0x2d   : > { %s808_s15 = sshll.u32 (!%p1387_p7), %s1441_s8, 6  ;;  %s252_s27 = scalar_lea.sflag (!%p1387_p7), [#allocation3], %s1441_s8 }
  0x2e   : > { %s1447_s4 = scalar_lea.vmem (!%p1387_p7), [#allocation2], %s808_s15 }
  0x2f   : > { %1251 = dma.done.wait (%p1374_p3), %s252_s27, 1024  }
  0x30   : > { %1253 = vsyncadd (%p1374_p3), %s252_s27, 4294966272 }
  0x31   : > { %1255 = dma.done.wait (%p1368_p1), [#allocation6], 1024  }
  0x32   : > { %1257 = vsyncadd (%p1368_p1), [#allocation6], 4294966272  ;;  %v898_v0 = vld [vmem:[#allocation5 + $0x38] sm:$0xff]  ;;  %v897_v1 = vld [vmem:[#allocation5 + $0x30] sm:$0xff]  ;;  %s1562_s10 = scalar_lea.vmem [#allocation7], %s808_s15  ;;  %s899_s11 = sshll.u32 %s1276_s18, 4 }
  0x33   : > { %428 = vmatpush.bf16.msra.mxu0 %v898_v0  ;;  %947 = vmatpush.bf16.msra.mxu1 %v898_v0  ;;  %v896_v2 = vld [vmem:[#allocation5 + $0x28] sm:$0xff]  ;;  %v895_v3 = vld [vmem:[#allocation5 + $0x20] sm:$0xff]  ;;  %v894_v4 = vld [vmem:[#allocation5 + $0x18] sm:$0xff]  ;;  %s878_s12 = sshll.u32 %s1280_s19, 5  ;;  %s1658_s23 = sld [smem:[#allocation17_spill]] }
  0x34   : > { %948 = vmatpush.bf16.msra.mxu2 %v898_v0  ;;  %949 = vmatpush.bf16.msra.mxu3 %v898_v0  ;;  %v893_v5 = vld [vmem:[#allocation5 + $0x10] sm:$0xff]  ;;  %v892_v6 = vld [vmem:[#allocation5 + $0x8] sm:$0xff]  ;;  %v891_v7 = vld [vmem:[#allocation5] sm:$0xff]  ;;  %s659_s13 = sadd.s32 %s899_s11, %s878_s12  ;;  %s662_s6 = sshll.u32 %s1562_s10, 4  ;;  %s663_s6 = int_to_ptr.vmem [resolvable:$true] %s662_s6 }
  0x35   : > { %v883_v8 = vld [vmem:[%s1447_s4] sm:$0xff]  ;;  %v885_v9 = vld [vmem:[%s1447_s4 + $0x10] sm:$0xff]  ;;  %v884_v12 = vld [vmem:[%s1447_s4 + $0x8] sm:$0xff]  ;;  %s879_s18 = sshll.u32 %s659_s13, 2  ;;  %s646_s28 = scalar_lea.sflag [#allocation4], %s1441_s8 }
  0x36   : > { %v887_v10 = vld [vmem:[%s1447_s4 + $0x20] sm:$0xff]  ;;  %v889_v11 = vld [vmem:[%s1447_s4 + $0x30] sm:$0xff]  ;;  %v886_v13 = vld [vmem:[%s1447_s4 + $0x18] sm:$0xff] }
  0x37   : > { %429 = vmatpush.bf16.msra.mxu0 %v897_v1  ;;  %950 = vmatpush.bf16.msra.mxu1 %v897_v1  ;;  %v888_v14 = vld [vmem:[%s1447_s4 + $0x28] sm:$0xff]  ;;  %v890_v15 = vld [vmem:[%s1447_s4 + $0x38] sm:$0xff]  ;;  %v1468_v16 = vld [vmem:[%s1630_s2] ss:$0 sm:$0xff] }
  0x38   : > { %951 = vmatpush.bf16.msra.mxu2 %v897_v1  ;;  %952 = vmatpush.bf16.msra.mxu3 %v897_v1  ;;  %v1473_v17 = vld [vmem:[%s1631_s3] ss:$0 sm:$0xff] }
  0x39   : > { %s661_s29 = scalar_lea.hbm %s1658_s23, %s879_s18  ;;  %s1210_s25 = scalar_lea.hbm %s1658_s23, 256 }
  0x3a   : > { %s664_s14 = sshll.u32 %s661_s29, 4  ;;  %s665_s14 = int_to_ptr.hbm [resolvable:$true] %s664_s14 }
  0x3b   : > { %430 = vmatpush.bf16.msra.mxu0 %v896_v2  ;;  %953 = vmatpush.bf16.msra.mxu1 %v896_v2  ;;  %s1204_s30 = sshra.s32 %s665_s14, 4  ;;  %s1205_s30 = int_to_ptr.hbm [resolvable:$true] %s1204_s30 }
  0x3c   : > { %954 = vmatpush.bf16.msra.mxu2 %v896_v2  ;;  %955 = vmatpush.bf16.msra.mxu3 %v896_v2  ;;  %s1206_s15 = scalar_lea.hbm %s1205_s30, 64  ;;  %p1211_p10 = scmp.lt.s32.totalorder %s1205_s30, %s1658_s23 }
  0x3d   : > { %p1207_p1 = scmp.ne.s32.totalorder %s1205_s30, %s1206_s15  ;;  %p1212_p11 = scmp.lt.s32.totalorder %s1210_s25, %s1206_s15 }
  0x3f   : > { %431 = vmatpush.bf16.msra.mxu0 %v895_v3  ;;  %956 = vmatpush.bf16.msra.mxu1 %v895_v3  ;;  %p1208_p3 = pnand %p1207_p1, %p1407_p2  ;;  %p1213_p12 = por %p1212_p11, %p1211_p10 }
  0x40   : > { %957 = vmatpush.bf16.msra.mxu2 %v895_v3  ;;  %958 = vmatpush.bf16.msra.mxu3 %v895_v3 }
  0x41   : > { %p1209_p7 = pneg %p1208_p3 }
  0x43   : > { %432 = vmatpush.bf16.msra.mxu0 %v894_v4  ;;  %959 = vmatpush.bf16.msra.mxu1 %v894_v4  ;;  %p1214_p13 = pnand %p1213_p12, %p1209_p7 }
  0x44   : > { %960 = vmatpush.bf16.msra.mxu2 %v894_v4  ;;  %961 = vmatpush.bf16.msra.mxu3 %v894_v4 }
  0x47   : > { %433 = vmatpush.bf16.msra.mxu0 %v893_v5  ;;  %962 = vmatpush.bf16.msra.mxu1 %v893_v5 }
  0x48   : > { %963 = vmatpush.bf16.msra.mxu2 %v893_v5  ;;  %964 = vmatpush.bf16.msra.mxu3 %v893_v5 }
  0x4b   : > { %434 = vmatpush.bf16.msra.mxu0 %v892_v6  ;;  %965 = vmatpush.bf16.msra.mxu1 %v892_v6 }
  0x4c   : > { %966 = vmatpush.bf16.msra.mxu2 %v892_v6  ;;  %967 = vmatpush.bf16.msra.mxu3 %v892_v6 }
  0x4f   : > { %435 = vmatpush.bf16.msra.mxu0 %v891_v7  ;;  %968 = vmatpush.bf16.msra.mxu1 %v891_v7 }
  0x50   : > { %969 = vmatpush.bf16.msra.mxu2 %v891_v7  ;;  %970 = vmatpush.bf16.msra.mxu3 %v891_v7 }
  0x52   : > { %436 = vmatmul.bf16.vlgmr.msra.gmra.mxu0 %v883_v8  ;;  %446 = vmatmul.bf16.vlgmr.msra.gmra.mxu1 %v885_v9 }
  0x53   : > { %456 = vmatmul.bf16.vlgmr.msra.gmra.mxu2 %v887_v10  ;;  %466 = vmatmul.bf16.vlgmr.msra.gmra.mxu3 %v889_v11 }
  0x62   : > { %441 = vmatmul.bf16.gmra.mxu0 %v884_v12  ;;  %451 = vmatmul.bf16.gmra.mxu1 %v886_v13 }
  0x63   : > { %461 = vmatmul.bf16.gmra.mxu2 %v888_v14  ;;  %471 = vmatmul.bf16.gmra.mxu3 %v890_v15 }
  0xcf   : > { %v437_v18 = vpop.f32.mrf.mxu0  ;;  %v447_v19 = vpop.f32.mrf.mxu1 }
  0xd0   : > { %v481_v20 = vmul.f32 %v1468_v16, %v437_v18  ;;  %v485_v21 = vmul.f32 %v1468_v16, %v447_v19 }
  0xd2   : > { %v1478_v22 = vadd.f32 %v1473_v17, %v481_v20  ;;  %v1481_v23 = vadd.f32 %v1473_v17, %v485_v21 }
  0xd4   : > { %v517_v24 = vsub.f32 0.0, %v1478_v22  ;;  %v521_v25 = vsub.f32 0.0, %v1481_v23 }
  0xd6   : > { %v533_v26 = vmul.f32 1.442695, %v517_v24  ;;  %v457_v27 = vpop.f32.mrf.mxu2  ;;  %v467_v28 = vpop.f32.mrf.mxu3  ;;  %v541_v29 = vmul.f32 1.442695, %v521_v25 }
  0xd7   : > { %v489_v30 = vmul.f32 %v1468_v16, %v457_v27  ;;  %v493_v31 = vmul.f32 %v1468_v16, %v467_v28  ;;  %v439_v32 = vpop.f32.mrf.mxu0  ;;  %v449_v33 = vpop.f32.mrf.mxu1 }
  0xd8   : > { %v482_v34 = vmul.f32 %v1468_v16, %v439_v32  ;;  %v486_v35 = vmul.f32 %v1468_v16, %v449_v33  ;;  %1066 = vpow2.f32 %v533_v26 }
  0xd9   : > { %v1490_v36 = vadd.f32 %v1473_v17, %v489_v30  ;;  %v1493_v37 = vadd.f32 %v1473_v17, %v493_v31  ;;  %1068 = vpow2.f32 %v541_v29 }
  0xda   : > { %v1496_v38 = vadd.f32 %v1473_v17, %v482_v34  ;;  %v1499_v39 = vadd.f32 %v1473_v17, %v486_v35 }
  0xdb   : > { %v525_v40 = vsub.f32 0.0, %v1490_v36  ;;  %v529_v41 = vsub.f32 0.0, %v1493_v37 }
  0xdc   : > { %v518_v42 = vsub.f32 0.0, %v1496_v38  ;;  %v522_v43 = vsub.f32 0.0, %v1499_v39 }
  0xdd   : > { %v549_v44 = vmul.f32 1.442695, %v525_v40  ;;  %v557_v45 = vmul.f32 1.442695, %v529_v41 }
  0xde   : > { %v459_v46 = vpop.f32.mrf.mxu2  ;;  %v469_v47 = vpop.f32.mrf.mxu3  ;;  %v535_v49 = vmul.f32 1.442695, %v518_v42  ;;  %v543_v54 = vmul.f32 1.442695, %v522_v43 }
  0xdf   : > { %v1067_v48 = vpop.eup %1066  ;;  %1070 = vpow2.f32 %v549_v44  ;;  %v490_v50 = vmul.f32 %v1468_v16, %v459_v46  ;;  %v494_v51 = vmul.f32 %v1468_v16, %v469_v47  ;;  %v442_v52 = vpop.f32.mrf.mxu0 }
  0xe0   : > { %v452_v53 = vpop.f32.mrf.mxu1  ;;  %v483_v55 = vmul.f32 %v1468_v16, %v442_v52  ;;  %v1069_v57 = vpop.eup %1068  ;;  %v565_v60 = vadd.f32 1.0, %v1067_v48  ;;  %1072 = vpow2.f32 %v557_v45 }
  0xe1   : > { %v487_v56 = vmul.f32 %v1468_v16, %v452_v53  ;;  %v1510_v58 = vadd.f32 %v1473_v17, %v490_v50  ;;  %v1513_v59 = vadd.f32 %v1473_v17, %v494_v51  ;;  %1074 = vpow2.f32 %v535_v49 }
  0xe2   : > { %v1516_v61 = vadd.f32 %v1473_v17, %v483_v55  ;;  %v569_v1 = vadd.f32 1.0, %v1069_v57  ;;  %1076 = vpow2.f32 %v543_v54 }
  0xe3   : > { %v1519_v62 = vadd.f32 %v1473_v17, %v487_v56  ;;  %v526_v63 = vsub.f32 0.0, %v1510_v58  ;;  %v530_v0 = vsub.f32 0.0, %v1513_v59  ;;  %1078 = vrcp.f32 %v565_v60 }
  0xe4   : > { %v519_v2 = vsub.f32 0.0, %v1516_v61 }
  0xe5   : > { %v1071_v3 = vpop.eup %1070  ;;  %v551_v4 = vmul.f32 1.442695, %v526_v63  ;;  %v523_v5 = vsub.f32 0.0, %v1519_v62  ;;  %v559_v7 = vmul.f32 1.442695, %v530_v0 }
  0xe6   : > { %v573_v6 = vadd.f32 1.0, %v1071_v3  ;;  %v462_v8 = vpop.f32.mrf.mxu2  ;;  %v472_v9 = vpop.f32.mrf.mxu3  ;;  %v537_v10 = vmul.f32 1.442695, %v519_v2 }
  0xe7   : > { %1080 = vpow2.f32 %v551_v4  ;;  %v491_v11 = vmul.f32 %v1468_v16, %v462_v8  ;;  %v495_v12 = vmul.f32 %v1468_v16, %v472_v9  ;;  %v444_v13 = vpop.f32.mrf.mxu0  ;;  %v1073_v15 = vpop.eup %1072  ;;  %v545_v21 = vmul.f32 1.442695, %v523_v5 }
  0xe8   : > { %v454_v14 = vpop.f32.mrf.mxu1  ;;  %1082 = vrcp.f32 %v569_v1  ;;  %v484_v18 = vmul.f32 %v1468_v16, %v444_v13  ;;  %v1075_v20 = vpop.eup %1074  ;;  %v577_v30 = vadd.f32 1.0, %v1073_v15 }
  0xe9   : > { %v488_v19 = vmul.f32 %v1468_v16, %v454_v14  ;;  %1084 = vrcp.f32 %v573_v6  ;;  %v1530_v24 = vadd.f32 %v1473_v17, %v491_v11  ;;  %v1533_v25 = vadd.f32 %v1473_v17, %v495_v12  ;;  %v1077_v26 = vpop.eup %1076 }
  0xea   : > { %v566_v27 = vadd.f32 1.0, %v1075_v20  ;;  %1086 = vpow2.f32 %v559_v7  ;;  %v1536_v28 = vadd.f32 %v1473_v17, %v484_v18  ;;  %v570_v31 = vadd.f32 1.0, %v1077_v26  ;;  %v1079_v33 = vpop.eup %1078 }
  0xeb   : > { %v1539_v29 = vadd.f32 %v1473_v17, %v488_v19  ;;  %1088 = vpow2.f32 %v537_v10  ;;  %v527_v32 = vsub.f32 0.0, %v1530_v24  ;;  %v531_v44 = vsub.f32 0.0, %v1533_v25 }
  0xec   : > { %1090 = vrcp.f32 %v566_v27  ;;  %v520_v34 = vsub.f32 0.0, %v1536_v28  ;;  %v597_v0 = vmul.f32 %v1079_v33, %v1478_v22 }
  0xed   : > { %v524_v35 = vsub.f32 0.0, %v1539_v29  ;;  %v1081_v40 = vpop.eup %1080  ;;  %1092 = vrcp.f32 %v570_v31  ;;  %v553_v41 = vmul.f32 1.442695, %v527_v32  ;;  %v561_v60 = vmul.f32 1.442695, %v531_v44 }
  0xee   : > { %v1083_v42 = vpop.eup %1082  ;;  %v574_v43 = vadd.f32 1.0, %v1081_v40  ;;  %1094 = vpow2.f32 %v545_v21  ;;  %v539_v45 = vmul.f32 1.442695, %v520_v34  ;;  %v464_v46 = vpop.f32.mrf.mxu2 }
  0xef   : > { %v474_v47 = vpop.f32.mrf.mxu3  ;;  %v1085_v48 = vpop.eup %1084  ;;  %1096 = vrcp.f32 %v577_v30  ;;  %v492_v49 = vmul.f32 %v1468_v16, %v464_v46  ;;  %v547_v52 = vmul.f32 1.442695, %v524_v35  ;;  %v601_v3 = vmul.f32 %v1083_v42, %v1481_v23 }
  0xf0   : > { %v496_v50 = vmul.f32 %v1468_v16, %v474_v47  ;;  %v1087_v51 = vpop.eup %1086  ;;  %1098 = vrcp.f32 %v574_v43  ;;  %v605_v11 = vmul.f32 %v1085_v48, %v1490_v36 }
  0xf1   : > { %v1089_v53 = vpop.eup %1088  ;;  %v578_v54 = vadd.f32 1.0, %v1087_v51  ;;  %1100 = vpow2.f32 %v553_v41  ;;  %v1548_v55 = vadd.f32 %v1473_v17, %v492_v49 }
  0xf2   : > { %v1551_v56 = vadd.f32 %v1473_v17, %v496_v50  ;;  %v1091_v57 = vpop.eup %1090  ;;  %1102 = vpow2.f32 %v539_v45  ;;  %v567_v5 = vadd.f32 1.0, %v1089_v53 }
  0xf3   : > { %v1093_v63 = vpop.eup %1092  ;;  %v598_v16 = vmul.f32 %v1091_v57, %v1496_v38  ;;  %1104 = vrcp.f32 %v578_v54  ;;  %v528_v1 = vsub.f32 0.0, %v1548_v55 }
  0xf4   : > { %v1095_v2 = vpop.eup %1094  ;;  %v602_v4 = vmul.f32 %v1093_v63, %v1499_v39  ;;  %v532_v17 = vsub.f32 0.0, %v1551_v56  ;;  %1106 = vpow2.f32 %v547_v52 }
  0xf5   : > { %v1097_v6 = vpop.eup %1096  ;;  %v903_v7 = vpack.c.bf16 %v598_v16, %v597_v0  ;;  %v555_v8 = vmul.f32 1.442695, %v528_v1  ;;  %v571_v10 = vadd.f32 1.0, %v1095_v2  ;;  %1108 = vpow2.f32 %v561_v60 }
  0xf6   : > { %v1099_v9 = vpop.eup %1098  ;;  %v913_v22 = vpack.c.bf16 %v602_v4, %v601_v3  ;;  %1110 = vrcp.f32 %v567_v5  ;;  %v563_v12 = vmul.f32 1.442695, %v532_v17  ;;  %v609_v36 = vmul.f32 %v1097_v6, %v1493_v37 }
  0xf7   : > { %v1101_v38 = vpop.eup %1100  ;;  %904 = vst [vmem:[%s1562_s10] sm:$0xff] %v903_v7   ;;  %v606_v23 = vmul.f32 %v1099_v9, %v1510_v58  ;;  %1112 = vpow2.f32 %v555_v8 }
  0xf8   : > { %v1103_v39 = vpop.eup %1102  ;;  %941 = vst [vmem:[%s1562_s10 + $0x10] sm:$0xff] %v913_v22   ;;  %1114 = vrcp.f32 %v571_v10  ;;  %v575_v21 = vadd.f32 1.0, %v1101_v38 }
  0xf9   : > { %v1105_v13 = vpop.eup %1104  ;;  %v923_v14 = vpack.c.bf16 %v606_v23, %v605_v11  ;;  %v568_v15 = vadd.f32 1.0, %v1103_v39 }
  0xfa   : > { %v610_v18 = vmul.f32 %v1105_v13, %v1513_v59  ;;  %v1107_v19 = vpop.eup %1106 }
  0xfb   : > { %943 = vst [vmem:[%s1562_s10 + $0x20] sm:$0xff] %v923_v14   ;;  %1116 = vrcp.f32 %v568_v15  ;;  %v1109_v58 = vpop.eup %1108  ;;  %v572_v26 = vadd.f32 1.0, %v1107_v19 }
  0xfc   : > { %v933_v20 = vpack.c.bf16 %v610_v18, %v609_v36  ;;  %1118 = vpow2.f32 %v563_v12  ;;  %v1111_v27 = vpop.eup %1110  ;;  %v579_v31 = vadd.f32 1.0, %v1109_v58 }
  0xfd   : > { %1120 = vrcp.f32 %v572_v26  ;;  %v1113_v30 = vpop.eup %1112  ;;  %v599_v34 = vmul.f32 %v1111_v27, %v1516_v61 }
  0xfe   : > { %945 = vst [vmem:[%s1562_s10 + $0x30] sm:$0xff] %v933_v20   ;;  %v1115_v32 = vpop.eup %1114  ;;  %1122 = vrcp.f32 %v575_v21  ;;  %v576_v37 = vadd.f32 1.0, %v1113_v30 }
  0xff   : > { %v603_v43 = vmul.f32 %v1115_v32, %v1519_v62 }
 0x100   : > { %1124 = vrcp.f32 %v576_v37 }
 0x101   : > { %v1117_v59 = vpop.eup %1116  ;;  %1126 = vrcp.f32 %v579_v31 }
 0x102   : > { %v1119_v33 = vpop.eup %1118  ;;  %v600_v35 = vmul.f32 %v1117_v59, %v1536_v28 }
 0x103   : > { %v580_v40 = vadd.f32 1.0, %v1119_v33  ;;  %v1121_v41 = vpop.eup %1120 }
 0x104   : > { %v908_v42 = vpack.c.bf16 %v600_v35, %v599_v34  ;;  %v604_v44 = vmul.f32 %v1121_v41, %v1539_v29  ;;  %v1123_v45 = vpop.eup %1122 }
 0x105   : > { %1128 = vrcp.f32 %v580_v40  ;;  %v607_v47 = vmul.f32 %v1123_v45, %v1530_v24 }
 0x106   : > { %940 = vst [vmem:[%s1562_s10 + $0x8] sm:$0xff] %v908_v42   ;;  %v918_v46 = vpack.c.bf16 %v604_v44, %v603_v43  ;;  %v1125_v61 = vpop.eup %1124 }
 0x107   : > { %v1127_v28 = vpop.eup %1126  ;;  %v608_v62 = vmul.f32 %v1125_v61, %v1548_v55 }
 0x108   : > { %942 = vst [vmem:[%s1562_s10 + $0x18] sm:$0xff] %v918_v46   ;;  %v611_v49 = vmul.f32 %v1127_v28, %v1533_v25 }
 0x109   : > { %v928_v48 = vpack.c.bf16 %v608_v62, %v607_v47 }
 0x10b   : > { %v1129_v29 = vpop.eup %1128  ;;  %944 = vst [vmem:[%s1562_s10 + $0x28] sm:$0xff] %v928_v48  }
 0x10c   : > { %v612_v50 = vmul.f32 %v1129_v29, %v1551_v56 }
 0x10e   : > { %v938_v51 = vpack.c.bf16 %v612_v50, %v611_v49 }
 0x110   : > { %946 = vst [vmem:[%s1562_s10 + $0x38] sm:$0xff] %v938_v51  }
 0x111   : > { %1217 = shalt.err (!%p1214_p13)
}
 0x112   : > { %s1297_s8 = smov 64   ;;  %s1298_s9 = smov 4  }
 0x113   : > { %977 = dma.vmem_to_hbm [thread:$0]  (%p1407_p2), %s663_s6, 1024, %s665_s14, %s646_s28, %s1297_s8, %s1297_s8, %s1298_s9  }
 0x114 PF: > { %s1660_s10 = sld [smem:[#allocation11_spill]]  ;;  %p994_p0 = scmp.ge.s32.totalorder %s1292_s22, 2 }
 0x116   : > { %p988_p4 = pnand %p994_p0, %p1379_p5 }
 0x118   : > { %p989_p6 = pneg %p988_p4 }
 0x11a   : > { %s679_s12 = sand.u32 1, %s1660_s10  }
 0x11b   : > { %s680_s13 = scalar_lea.sflag [#allocation4], %s679_s12 }
 0x11c   : > { %1259 = dma.done.wait (%p989_p6), %s680_s13, 1024  }
 0x11d   : > { %1261 = vsyncadd (%p989_p6), %s680_s13, 4294966272  ;;  %s21_s22 = sadd.s32 1, %s1292_s22   ;;  %s1662_s24 = sld [smem:[#allocation13_spill]] }
 0x11e   : > { %p18_p8 = scmp.ge.s32.totalorder %s21_s22, 6   ;;  %s1663_s29 = sld [smem:[#allocation15_spill]] }
 0x11f   : > { %s1664_s15 = smov %s1268_s16  ;;  %s1665_s16 = smov %s1272_s17 }
 0x120   : > { %s1666_s17 = smov %s1426_s1  ;;  %s1667_s18 = smov %s1284_s20 }
 0x121   : > { %s1668_s19 = smov %s1288_s21  ;;  %20 = sbr.rel (!%p18_p8) target bundleno = 11 (0xb), region = 92 }
 0x123   : > { %s1669_s20 = smov %s1662_s24 }
 0x124   : > { %s1670_s21 = smov %s1663_s29 }
 0x126   :  { %686 = vsyncpa [#allocation3], 1 }
 0x127   :  { %688 = vsyncpa [#allocation3 + $0x1], 1 }
 0x128   :  { %689 = vsyncpa [#allocation6], 1 }
 0x129   :  { %690 = vsyncpa [#allocation4], 1 }
 0x12a   :  { %692 = vsyncpa [#allocation4 + $0x1], 1 }

</bundles_post_ra>
